<compile_context>
chip_gen: v7x
topology: tpu7x:2x2x1
jax: 0.10.0
libtpu: 0.0.40
codegen_flags: <defaults>
</compile_context>

<pallas_src>
import jax
import jax.numpy as jnp
from jax.experimental import pallas as pl
from jax.experimental.pallas import tpu as pltpu

# Batch tile cap.  With f32 x streaming, a 2048-row tile is
#   2048 rows * 896 lanes (784 padded to lane tiles) * 4 B = 7.0 MiB / buffer,
# ~14 MiB double-buffered + ~2 MiB out double-buffer + <1 MiB resident weights
# + ~2 MiB f32/bf16 h1 intermediates  ->  ~19 MiB, fits every generation
# (v7x: 64 MiB physical) with vmem_limit_bytes=40 MiB (v5e default is 16 MiB).
TB_MAX = 2048


def _round_up(x, m):
    return ((x + m - 1) // m) * m


def _sqnl(x):
    # SQNL:  x>2 -> 1 ; 0<=x<=2 -> x - x^2/4 ; -2<=x<0 -> x + x^2/4 ; x<-2 -> -1
    # clip + abs form (fewer VPU selects); identical piecewise values.
    xc = jnp.clip(x, -2.0, 2.0)
    return xc - 0.25 * xc * jnp.abs(xc)


def simple_nn_kernel(x_ref, w1_ref, b1_ref, w23_ref, b23_ref, o_ref):
    # x tile streamed at native dtype (f32); cast to bf16 in VMEM (no extra
    # HBM traffic).  Weights are resident bf16; biases f32; f32 accumulation.
    x = x_ref[...].astype(jnp.bfloat16)
    h1 = jnp.dot(x, w1_ref[...], preferred_element_type=jnp.float32)
    h1 = h1 + b1_ref[...]                      # [TB, 128] f32
    h1 = _sqnl(h1)                             # f32 VPU math
    h1 = h1.astype(jnp.bfloat16)               # back to MXU-native input dtype
    out = jnp.dot(h1, w23_ref[...], preferred_element_type=jnp.float32)
    out = out + b23_ref[...]                   # [TB, 10] f32
    o_ref[...] = out.astype(o_ref.dtype)


def prepare_params(params):
    """One-time weight preprocessing (hoisted out of the per-call forward).

    Folds fc2 o fc3 (no activation between them in SimpleNN):
      W23 = W2 @ W3,  b23 = b2 @ W3 + b3   (exact up to f32 rounding)
    and casts the memory-bound weight streams to bf16.
    """
    w1, b1, w2, b2, w3, b3 = params
    w23 = w2 @ w3                               # [128, 10]
    b23 = b2 @ w3 + b3                          # [10]
    return (
        w1.astype(jnp.bfloat16),                # [784, 128]
        b1.reshape(1, -1).astype(jnp.float32),  # [1, 128]
        w23.astype(jnp.bfloat16),               # [128, 10]
        b23.reshape(1, -1).astype(jnp.float32), # [1, 10]
    )


def simple_nn_forward(x, prepared):
    # x: [B, 1, 28, 28] NCHW (or already [B, 784]); glue reshape stays in JAX.
    w1_bf, b1r, w23_bf, b23r = prepared
    x2d = x.reshape(-1, 28 * 28)                # no dtype cast, no pad
    B = x2d.shape[0]

    # Batch tile: multiple of 16 (sublane packing for the bf16 intermediates),
    # capped at TB_MAX.  Once B > 256, force at least 2 grid steps so the
    # "parallel" batch axis shards across v7x's two TensorCores.
    if B > 256:
        tb = min(TB_MAX, _round_up(pl.cdiv(B, 2), 16))
    else:
        tb = min(TB_MAX, _round_up(B, 16))
    n_blocks = pl.cdiv(B, tb)                   # ragged last block handled by
                                                # the pipeline (masked writes)

    const2 = lambda i: (0, 0)                   # weights/biases stay resident
    out = pl.pallas_call(
        simple_nn_kernel,
        out_shape=jax.ShapeDtypeStruct((B, 10), jnp.float32),
        grid_spec=pltpu.PrefetchScalarGridSpec(
            num_scalar_prefetch=0,
            grid=(n_blocks,),
            in_specs=[
                pl.BlockSpec((tb, 28 * 28), lambda i: (i, 0)),  # streamed x
                pl.BlockSpec(w1_bf.shape, const2),
                pl.BlockSpec(b1r.shape, const2),
                pl.BlockSpec(w23_bf.shape, const2),
                pl.BlockSpec(b23r.shape, const2),
            ],
            out_specs=pl.BlockSpec((tb, 10), lambda i: (i, 0)),
        ),
        compiler_params=pltpu.CompilerParams(
            dimension_semantics=("parallel",),   # shard batch axis across TCs
            vmem_limit_bytes=40 << 20,           # v5e default (16 MiB) is too
                                                 # tight for TB=2048 f32 tiles
        ),
    )(x2d, w1_bf, b1r, w23_bf, b23r)
    return out


def init_params(key):
    # Deterministic init matching nn.Linear shapes (stored as [in, out]).
    ks = jax.random.split(key, 6)

    def lin(kw, kb, fan_in, fan_out):
        bound = 1.0 / jnp.sqrt(fan_in)
        w = jax.random.uniform(kw, (fan_in, fan_out), jnp.float32, -bound, bound)
        b = jax.random.uniform(kb, (fan_out,), jnp.float32, -bound, bound)
        return w, b

    w1, b1 = lin(ks[0], ks[1], 28 * 28, 128)
    w2, b2 = lin(ks[2], ks[3], 128, 64)
    w3, b3 = lin(ks[4], ks[5], 64, 10)
    return (w1, b1, w2, b2, w3, b3)


if __name__ == "__main__":
    key = jax.random.PRNGKey(0)
    kx, kp = jax.random.split(key)
    params = init_params(kp)
    prepared = prepare_params(params)           # one-time weight prep

    # Small batch of MNIST-shaped inputs, NCHW.
    x = jax.random.normal(kx, (8, 1, 28, 28), jnp.float32)

    out = simple_nn_forward(x, prepared)
    out = jax.block_until_ready(out)
    assert out.shape == (8, 10), out.shape

    # Reference 1: mirrors the kernel's numerics (bf16 streams, f32 accum,
    # fc2/fc3 fold) -> tight tolerance check of the kernel structure.
    def ref_bf16(x, p):
        w1, b1, w2, b2, w3, b3 = p
        w23 = w2 @ w3
        b23 = b2 @ w3 + b3
        h = jnp.dot(x.reshape(-1, 784).astype(jnp.bfloat16),
                    w1.astype(jnp.bfloat16),
                    preferred_element_type=jnp.float32) + b1
        h = _sqnl(h)
        h = jnp.dot(h.astype(jnp.bfloat16), w23.astype(jnp.bfloat16),
                    preferred_element_type=jnp.float32) + b23
        return h

    r_bf = jax.block_until_ready(ref_bf16(x, params))
    assert jnp.allclose(out, r_bf, atol=1e-3, rtol=1e-3), (
        float(jnp.max(jnp.abs(out - r_bf))))

    # Reference 2: original full-f32 module semantics -> loose tolerance
    # (bf16 weight/x quantization is the only difference).
    def ref_f32(x, p):
        w1, b1, w2, b2, w3, b3 = p
        h = x.reshape(-1, 784) @ w1 + b1
        q = h * h * 0.25
        h = jnp.where(h >= 0.0,
                      jnp.where(h > 2.0, 1.0, h - q),
                      jnp.where(h < -2.0, -1.0, h + q))
        h = h @ w2 + b2
        return h @ w3 + b3

    r_f32 = jax.block_until_ready(ref_f32(x, params))
    assert jnp.allclose(out, r_f32, atol=3e-2, rtol=3e-2), (
        float(jnp.max(jnp.abs(out - r_f32))))

    print("KERNEL_OK")
</pallas_src>

<mosaic_0001>
module attributes {stable_mosaic.version = 11 : i64} {
  func.func @simple_nn_kernel(%arg0: i32, %arg1: memref<16x784xf32, #tpu.memory_space<vmem>>, %arg2: memref<784x128xbf16, #tpu.memory_space<vmem>>, %arg3: memref<1x128xf32, #tpu.memory_space<vmem>>, %arg4: memref<128x10xbf16, #tpu.memory_space<vmem>>, %arg5: memref<1x10xf32, #tpu.memory_space<vmem>>, %arg6: memref<16x10xf32, #tpu.memory_space<vmem>>) attributes {dimension_semantics = [#tpu.dimension_semantics<parallel>], iteration_bounds = array<i64: 1>, scalar_prefetch = 0 : i64, scratch_operands = 0 : i64, tpu.core_type = #tpu.core_type<tc>, window_params = [{transform_indices = @transform_0, window_bounds = array<i64: 16, 784>}, {pipeline_mode = #tpu.pipeline_mode<synchronous>, transform_indices = @transform_1, window_bounds = array<i64: 784, 128>}, {pipeline_mode = #tpu.pipeline_mode<synchronous>, transform_indices = @transform_2, window_bounds = array<i64: 1, 128>}, {pipeline_mode = #tpu.pipeline_mode<synchronous>, transform_indices = @transform_3, window_bounds = array<i64: 128, 10>}, {pipeline_mode = #tpu.pipeline_mode<synchronous>, transform_indices = @transform_4, window_bounds = array<i64: 1, 10>}, {transform_indices = @transform_5, window_bounds = array<i64: 16, 10>}]} {
    %c0 = arith.constant 0 : index
    %c0_0 = arith.constant 0 : index
    %0 = vector.load %arg1[%c0, %c0_0] : memref<16x784xf32, #tpu.memory_space<vmem>>, vector<16x784xf32>
    %1 = arith.truncf %0 : vector<16x784xf32> to vector<16x784xbf16>
    %c0_1 = arith.constant 0 : index
    %c0_2 = arith.constant 0 : index
    %2 = vector.load %arg2[%c0_1, %c0_2] : memref<784x128xbf16, #tpu.memory_space<vmem>>, vector<784x128xbf16>
    %cst = arith.constant dense<0.000000e+00> : vector<16x128xf32>
    %3 = tpu.matmul %1, %2, %cst {dimension_numbers = #tpu.dot_dimension_numbers<[1], [0], [0], [1], [0, 0, 1, 1], [], []>} : vector<16x784xbf16>, vector<784x128xbf16>, vector<16x128xf32> -> vector<16x128xf32>
    %c0_3 = arith.constant 0 : index
    %c0_4 = arith.constant 0 : index
    %4 = vector.load %arg3[%c0_3, %c0_4] : memref<1x128xf32, #tpu.memory_space<vmem>>, vector<1x128xf32>
    %5 = vector.broadcast %4 : vector<1x128xf32> to vector<16x128xf32>
    %6 = arith.addf %3, %5 : vector<16x128xf32>
    %cst_5 = arith.constant -2.000000e+00 : f32
    %cst_6 = arith.constant 2.000000e+00 : f32
    %7 = vector.broadcast %cst_5 : f32 to vector<16x128xf32>
    %8 = arith.maximumf %7, %6 : vector<16x128xf32>
    %9 = vector.broadcast %cst_6 : f32 to vector<16x128xf32>
    %10 = arith.minimumf %9, %8 : vector<16x128xf32>
    %cst_7 = arith.constant 2.500000e-01 : f32
    %11 = vector.broadcast %cst_7 : f32 to vector<16x128xf32>
    %12 = arith.mulf %11, %10 : vector<16x128xf32>
    %13 = math.absf %10 : vector<16x128xf32>
    %14 = arith.mulf %12, %13 : vector<16x128xf32>
    %15 = arith.subf %10, %14 : vector<16x128xf32>
    %16 = arith.truncf %15 : vector<16x128xf32> to vector<16x128xbf16>
    %c0_8 = arith.constant 0 : index
    %c0_9 = arith.constant 0 : index
    %17 = vector.load %arg4[%c0_8, %c0_9] : memref<128x10xbf16, #tpu.memory_space<vmem>>, vector<128x10xbf16>
    %cst_10 = arith.constant dense<0.000000e+00> : vector<16x10xf32>
    %18 = tpu.matmul %16, %17, %cst_10 {dimension_numbers = #tpu.dot_dimension_numbers<[1], [0], [0], [1], [0, 0, 1, 1], [], []>} : vector<16x128xbf16>, vector<128x10xbf16>, vector<16x10xf32> -> vector<16x10xf32>
    %c0_11 = arith.constant 0 : index
    %c0_12 = arith.constant 0 : index
    %19 = vector.load %arg5[%c0_11, %c0_12] : memref<1x10xf32, #tpu.memory_space<vmem>>, vector<1x10xf32>
    %20 = vector.broadcast %19 : vector<1x10xf32> to vector<16x10xf32>
    %21 = arith.addf %18, %20 : vector<16x10xf32>
    %c0_13 = arith.constant 0 : index
    %c0_14 = arith.constant 0 : index
    %22 = vector.load %arg6[%c0_13, %c0_14] : memref<16x10xf32, #tpu.memory_space<vmem>>, vector<16x10xf32>
    tpu.vector_store %arg6[%c0_13, %c0_14], %21 {strides = array<i32>} : memref<16x10xf32, #tpu.memory_space<vmem>>, vector<16x10xf32>,
    return
  }
  func.func @transform_0(%arg0: i32) -> (i32, i32) {
    %c0_i32 = arith.constant 0 : i32
    %c0_i32_0 = arith.constant 0 : i32
    return %arg0, %c0_i32 : i32, i32
  }
  func.func @transform_1(%arg0: i32) -> (i32, i32) {
    %c0_i32 = arith.constant 0 : i32
    %c0_i32_0 = arith.constant 0 : i32
    %c0_i32_1 = arith.constant 0 : i32
    return %c0_i32, %c0_i32_0 : i32, i32
  }
  func.func @transform_2(%arg0: i32) -> (i32, i32) {
    %c0_i32 = arith.constant 0 : i32
    %c0_i32_0 = arith.constant 0 : i32
    %c0_i32_1 = arith.constant 0 : i32
    return %c0_i32, %c0_i32_0 : i32, i32
  }
  func.func @transform_3(%arg0: i32) -> (i32, i32) {
    %c0_i32 = arith.constant 0 : i32
    %c0_i32_0 = arith.constant 0 : i32
    %c0_i32_1 = arith.constant 0 : i32
    return %c0_i32, %c0_i32_0 : i32, i32
  }
  func.func @transform_4(%arg0: i32) -> (i32, i32) {
    %c0_i32 = arith.constant 0 : i32
    %c0_i32_0 = arith.constant 0 : i32
    %c0_i32_1 = arith.constant 0 : i32
    return %c0_i32, %c0_i32_0 : i32, i32
  }
  func.func @transform_5(%arg0: i32) -> (i32, i32) {
    %c0_i32 = arith.constant 0 : i32
    %c0_i32_0 = arith.constant 0 : i32
    return %arg0, %c0_i32 : i32, i32
  }
}

</mosaic_0001>

<bundles_post_ra>
// kernel: tpu_custom_call.1
= control target key start
LH: loop header
LB: loop body
LE: loop exit
PB: predicated region body
PF: predicated region fallthrough
CT: control target
= control target key end

     0   :  { %10 = vsyncpa [#allocation3], 0  ;;  %s1194_s0 = inlined_call_operand.vmem [shape: f32[8,784], index: 0, kind: input, shape index: {}]   ;;  %s1195_s1 = inlined_call_operand.hbm [shape: bf16[784,128], index: 1, kind: input, shape index: {}]   ;;  %s1196_s2 = inlined_call_operand.vmem [shape: f32[1,128], index: 2, kind: input, shape index: {}]   ;;  %s1197_s3 = inlined_call_operand.vmem [shape: bf16[128,10], index: 3, kind: input, shape index: {}]   ;;  %s1198_s4 = inlined_call_operand.vmem [shape: f32[1,10], index: 4, kind: input, shape index: {}]   ;;  %s1199_s5 = inlined_call_operand.hbm [shape: f32[8,10], index: 5, kind: output, shape index: {}]  }
   0x1   :  { %11 = vsyncpa [#allocation4], 0  ;;  %s1047_s18 = smov [#allocation2]   ;;  %s999_s22 = scalar_lea.hbm %s1195_s1, 6272 }
   0x2   :  { %s19_s19 = sshll.u32 %s1047_s18, 4  ;;  %p1000_p0 = scmp.ne.s32.totalorder %s1195_s1, %s999_s22  ;;  %s20_s19 = int_to_ptr.vmem [resolvable:$true] %s19_s19 }
   0x3   :  { %p1003_p1 = scmp.lt.u32.totalorder %s999_s22, %s1195_s1 }
   0x5   :  { %p1005_p2 = pnand %p1003_p1, %p1000_p0 }
   0x7   :  { %1008 = shalt.err (!%p1005_p2)
}
   0x8   :  { %s1009_s27 = scalar_lea.vmem %s20_s19, 6272  ;;  %p1014_p4 = scmp.lt.s32.totalorder %s20_s19, %s20_s19 }
   0x9   :  { %p1010_p3 = scmp.ne.s32.totalorder %s20_s19, %s1009_s27  ;;  %p1015_p5 = scmp.lt.s32.totalorder %s1009_s27, %s1009_s27 }
   0xb   :  { %p1016_p6 = por %p1015_p5, %p1014_p4 }
   0xd   :  { %p1017_p7 = pnand %p1016_p6, %p1010_p3 }
   0xf   :  { %1020 = shalt.err (!%p1017_p7)
}
  0x10   :  { %s1048_s28 = smov 64   ;;  %s1049_s29 = smov 4  }
  0x11   :  { %25 = dma.hbm_to_vmem [thread:$0]  %s1195_s1, 6272, %s20_s19, [#allocation3], %s1048_s28, %s1048_s28, %s1049_s29  }
  0x12   :  { %1043 = dma.done.wait [#allocation3], 6272  }
  0x13   :  { %1044 = vsyncadd [#allocation3], 4294961024  ;;  %v942_v0 = vld [vmem:[#allocation2 + $0x40] sm:$0xff]   ;;  %v946_v4 = vld [vmem:[#allocation2 + $0x48] sm:$0xff]   ;;  %v1050_v43 = vmov 0.0   ;;  %vm1051_vm0 = vmmov 0  }
  0x14   :  { %v943_v1 = vld [vmem:[#allocation2] sm:$0xff]   ;;  %831 = vmatprep.subr.bf16.mxu0 %v942_v0  ;;  %v947_v5 = vld [vmem:[#allocation2 + $0x8] sm:$0xff]   ;;  %v950_v8 = vld [vmem:[#allocation2 + $0x50] sm:$0xff]   ;;  %vm456_vm1 = vcmask 130048   ;;  %vm749_vm2 = vcmask 80896  }
  0x15   :  { %v944_v2 = vld [vmem:[#allocation2 + $0xc0] sm:$0xff]   ;;  %832 = vmatpush3.bf16.msra.mxu0 %v943_v1  ;;  %v948_v6 = vld [vmem:[#allocation2 + $0xc8] sm:$0xff]   ;;  %v951_v9 = vld [vmem:[#allocation2 + $0x10] sm:$0xff]  }
  0x16   :  { %v945_v3 = vld [vmem:[#allocation2 + $0x80] sm:$0xff]   ;;  %853 = vmatprep.subr.bf16.mxu1 %v944_v2  ;;  %833 = vmatprep.subr.bf16.mxu0 %v946_v4  ;;  %v949_v7 = vld [vmem:[#allocation2 + $0x88] sm:$0xff]   ;;  %v952_v10 = vld [vmem:[#allocation2 + $0xd0] sm:$0xff]  }
  0x17   :  { %854 = vmatpush3.bf16.msra.mxu1 %v945_v3  ;;  %v953_v11 = vld [vmem:[#allocation2 + $0x90] sm:$0xff]   ;;  %v954_v12 = vld [vmem:[#allocation2 + $0x58] sm:$0xff]   ;;  %v958_v16 = vld [vmem:[#allocation2 + $0x60] sm:$0xff]  }
  0x18   :  { %855 = vmatprep.subr.bf16.mxu1 %v948_v6  ;;  %v955_v13 = vld [vmem:[#allocation2 + $0x18] sm:$0xff]   ;;  %v959_v17 = vld [vmem:[#allocation2 + $0x20] sm:$0xff]   ;;  %v962_v20 = vld [vmem:[#allocation2 + $0x68] sm:$0xff]  }
  0x19   :  { %834 = vmatpush3.bf16.msra.mxu0 %v947_v5  ;;  %v956_v14 = vld [vmem:[#allocation2 + $0xd8] sm:$0xff]   ;;  %v960_v18 = vld [vmem:[#allocation2 + $0xe0] sm:$0xff]   ;;  %v963_v21 = vld [vmem:[#allocation2 + $0x28] sm:$0xff]  }
  0x1a   :  { %835 = vmatprep.subr.bf16.mxu0 %v950_v8  ;;  %v957_v15 = vld [vmem:[#allocation2 + $0x98] sm:$0xff]   ;;  %v961_v19 = vld [vmem:[#allocation2 + $0xa0] sm:$0xff]   ;;  %v964_v22 = vld [vmem:[#allocation2 + $0xe8] sm:$0xff]  }
  0x1b   :  { %856 = vmatpush3.bf16.msra.mxu1 %v949_v7  ;;  %v965_v23 = vld [vmem:[#allocation2 + $0xa8] sm:$0xff]   ;;  %v966_v24 = vld [vmem:[#allocation2 + $0x70] sm:$0xff]   ;;  %v970_v28 = vld [vmem:[#allocation2 + $0x78] sm:$0xff]  }
  0x1c   :  { %857 = vmatprep.subr.bf16.mxu1 %v952_v10  ;;  %v967_v25 = vld [vmem:[#allocation2 + $0x30] sm:$0xff]   ;;  %v971_v29 = vld [vmem:[#allocation2 + $0x38] sm:$0xff]   ;;  %v37_v31 = vld [vmem:[%s1194_s0 + $0x8] sm:$0xff] }
  0x1d   :  { %836 = vmatpush3.bf16.msra.mxu0 %v951_v9  ;;  %v968_v26 = vld [vmem:[#allocation2 + $0xf0] sm:$0xff]   ;;  %v972_v30 = vld [vmem:[#allocation2 + $0xf8] sm:$0xff]   ;;  %v44_v32 = vld [vmem:[%s1194_s0 + $0x40] sm:$0xff] }
  0x1e   :  { %837 = vmatprep.subr.bf16.mxu0 %v954_v12  ;;  %v969_v27 = vld [vmem:[#allocation2 + $0xb0] sm:$0xff]   ;;  %v51_v33 = vpack.c.bf16 %v44_v32, %v37_v31  ;;  %v973_v34 = vld [vmem:[#allocation2 + $0xb8] sm:$0xff]   ;;  %v36_v35 = vld [vmem:[%s1194_s0] sm:$0xff] }
  0x1f   :  { %858 = vmatpush3.bf16.msra.mxu1 %v953_v11  ;;  %v43_v36 = vld [vmem:[%s1194_s0 + $0x38] sm:$0xff]  ;;  %v974_v38 = vld [vmem:[#allocation2 + $0x140] sm:$0xff]   ;;  %v46_v40 = vld [vmem:[%s1194_s0 + $0x50] sm:$0xff] }
  0x20   :  { %859 = vmatprep.subr.bf16.mxu1 %v956_v14  ;;  %492 = vmatprep.mubr.bf16.mxu0 %v51_v33  ;;  %v50_v37 = vpack.c.bf16 %v43_v36, %v36_v35  ;;  %v39_v39 = vld [vmem:[%s1194_s0 + $0x18] sm:$0xff]  ;;  %v975_v42 = vld [vmem:[#allocation2 + $0x100] sm:$0xff]   ;;  %v38_v44 = vld [vmem:[%s1194_s0 + $0x10] sm:$0xff] }
  0x21   :  { %838 = vmatpush3.bf16.msra.mxu0 %v955_v13  ;;  %v53_v41 = vpack.c.bf16 %v46_v40, %v39_v39  ;;  %v45_v45 = vld [vmem:[%s1194_s0 + $0x48] sm:$0xff]  ;;  %v978_v49 = vld [vmem:[#allocation2 + $0x150] sm:$0xff]   ;;  %v980_v51 = vld [vmem:[#allocation2 + $0x158] sm:$0xff]  }
  0x22   :  { %839 = vmatprep.subr.bf16.mxu0 %v958_v16  ;;  %v52_v46 = vpack.c.bf16 %v45_v45, %v38_v44  ;;  %v976_v47 = vld [vmem:[#allocation2 + $0x148] sm:$0xff]   ;;  %v979_v50 = vld [vmem:[#allocation2 + $0x110] sm:$0xff]   ;;  %v981_v52 = vld [vmem:[#allocation2 + $0x118] sm:$0xff]  }
  0x23   :  { %860 = vmatpush3.bf16.msra.mxu1 %v957_v15  ;;  %533 = vmatprep.mubr.bf16.mxu1 %v53_v41  ;;  %v977_v48 = vld [vmem:[#allocation2 + $0x108] sm:$0xff]   ;;  %v982_v53 = vld [vmem:[#allocation2 + $0x160] sm:$0xff]   ;;  %v986_v59 = vld [vmem:[#allocation2 + $0x170] sm:$0xff]  }
  0x24   :  { %861 = vmatprep.subr.bf16.mxu1 %v960_v18  ;;  %v983_v54 = vld [vmem:[#allocation2 + $0x120] sm:$0xff]   ;;  %v984_v55 = vld [vmem:[#allocation2 + $0x168] sm:$0xff]   ;;  %v42_v62 = vld [vmem:[%s1194_s0 + $0x30] sm:$0xff] }
  0x25   :  { %840 = vmatpush3.bf16.msra.mxu0 %v959_v17  ;;  %v990_v56 = vld [vmem:[#allocation2 + $0x180] sm:$0xff]   ;;  %v41_v57 = vld [vmem:[%s1194_s0 + $0x28] sm:$0xff]  ;;  %v987_v1 = vld [vmem:[#allocation2 + $0x130] sm:$0xff]  }
  0x26   :  { %841 = vmatprep.subr.bf16.mxu0 %v962_v20  ;;  %v985_v58 = vld [vmem:[#allocation2 + $0x128] sm:$0xff]   ;;  %v48_v60 = vld [vmem:[%s1194_s0 + $0x60] sm:$0xff]  ;;  %v988_v2 = vld [vmem:[#allocation2 + $0x178] sm:$0xff]  }
  0x27   :  { %862 = vmatpush3.bf16.msra.mxu1 %v961_v19  ;;  %v55_v61 = vpack.c.bf16 %v48_v60, %v41_v57  ;;  %v49_v63 = vld [vmem:[%s1194_s0 + $0x68] sm:$0xff]  ;;  %v989_v3 = vld [vmem:[#allocation2 + $0x138] sm:$0xff]   ;;  %v40_v4 = vld [vmem:[%s1194_s0 + $0x20] sm:$0xff] }
  0x28   :  { %863 = vmatprep.subr.bf16.mxu1 %v964_v22  ;;  %v56_v0 = vpack.c.bf16 %v49_v63, %v42_v62  ;;  %v47_v5 = vld [vmem:[%s1194_s0 + $0x58] sm:$0xff]  ;;  %v991_v7 = vld [vmem:[%s1197_s3] sm:$0xff]   ;;  %v992_v8 = vld [vmem:[%s1197_s3 + $0x8] sm:$0xff]  }
  0x29   :  { %842 = vmatpush3.bf16.msra.mxu0 %v963_v21  ;;  %v54_v6 = vpack.c.bf16 %v47_v5, %v40_v4  ;;  %v993_v9 = vld [vmem:[%s1197_s3 + $0x10] sm:$0xff]   ;;  %v994_v10 = vld [vmem:[%s1197_s3 + $0x18] sm:$0xff]   ;;  %v995_v11 = vld [vmem:[%s1197_s3 + $0x20] sm:$0xff]  }
  0x2a   :  { %843 = vmatprep.subr.bf16.mxu0 %v966_v24  ;;  %v996_v12 = vld [vmem:[%s1197_s3 + $0x28] sm:$0xff]   ;;  %v997_v13 = vld [vmem:[%s1197_s3 + $0x30] sm:$0xff]   ;;  %v998_v14 = vld [vmem:[%s1197_s3 + $0x38] sm:$0xff]  }
  0x2b   :  { %864 = vmatpush3.bf16.msra.mxu1 %v965_v23  ;;  %v769_v16 = vld [vmem:[%s1196_s2] ss:$0 sm:$0xff] }
  0x2c   :  { %865 = vmatprep.subr.bf16.mxu1 %v968_v26  ;;  %v822_v57 = vld [vmem:[%s1198_s4] ss:$0 sm:$0xff] }
  0x2d   :  { %844 = vmatpush3.bf16.msra.mxu0 %v967_v25 }
  0x2e   :  { %845 = vmatprep.subr.bf16.mxu0 %v970_v28 }
  0x2f   :  { %866 = vmatpush3.bf16.msra.mxu1 %v969_v27 }
  0x30   :  { %867 = vmatprep.subr.bf16.mxu1 %v972_v30 }
  0x31   :  { %846 = vmatpush3.bf16.msra.mxu0 %v971_v29 }
  0x32   :  { %875 = vmatprep.subr.bf16.mxu0 %v974_v38 }
  0x33   :  { %868 = vmatpush3.bf16.msra.mxu1 %v973_v34 }
  0x34   :  { %908 = vmatprep.subr.bf16.mxu1 %v1050_v43  ;;  %493 = vmatmul.mubr.bf16.vlgmr.msra.gmra.mrb[0].mxu0 %v50_v37 }
  0x35   :  { %876 = vmatpush3.bf16.msra.mxu0 %v975_v42  ;;  %574 = vmatprep.mubr.bf16.mxu0 %v55_v61 }
  0x36   :  { %534 = vmatmul.mubr.bf16.vlgmr.msra.gmra.mrb[0].mxu1 %v52_v46  ;;  %877 = vmatprep.subr.bf16.mxu0 %v976_v47 }
  0x37   :  { %910 = vmatprep.mubr.msk.bf16.mxu1 %vm1051_vm0, %v1050_v43  ;;  %909 = vmatpush3.bf16.msra.mxu1 %v990_v56 }
  0x38   :  { %914 = vmatprep.subr.bf16.mxu1 %v1050_v43 }
  0x39   :  { %878 = vmatpush3.bf16.msra.mxu0 %v977_v48 }
  0x3a   :  { %879 = vmatprep.subr.bf16.mxu0 %v978_v49 }
  0x3d   :  { %880 = vmatpush3.bf16.msra.mxu0 %v979_v50 }
  0x3e   :  { %881 = vmatprep.subr.bf16.mxu0 %v980_v51  ;;  %911 = vmatmul.mubr.msk.bf16.vlgmr.msra.gmra.mrb[4].mxu1 %vm456_vm1, %v56_v0 }
  0x3f   :  { %930 = vmatprep.mubr.msk.bf16.mxu1 %vm1051_vm0, %v1050_v43  ;;  %915 = vmatpush3.bf16.msra.mxu1 %v991_v7 }
  0x40   :  { %916 = vmatprep.subr.bf16.mxu1 %v1050_v43 }
  0x41   :  { %882 = vmatpush3.bf16.msra.mxu0 %v981_v52 }
  0x42   :  { %883 = vmatprep.subr.bf16.mxu0 %v982_v53 }
  0x43   :  { %917 = vmatpush3.bf16.msra.mxu1 %v992_v8 }
  0x44   :  { %918 = vmatprep.subr.bf16.mxu1 %v1050_v43 }
  0x45   :  { %884 = vmatpush3.bf16.msra.mxu0 %v983_v54 }
  0x46   :  { %885 = vmatprep.subr.bf16.mxu0 %v984_v55 }
  0x47   :  { %919 = vmatpush3.bf16.msra.mxu1 %v993_v9 }
  0x48   :  { %920 = vmatprep.subr.bf16.mxu1 %v1050_v43 }
  0x49   :  { %886 = vmatpush3.bf16.msra.mxu0 %v985_v58 }
  0x4a   :  { %887 = vmatprep.subr.bf16.mxu0 %v986_v59 }
  0x4b   :  { %921 = vmatpush3.bf16.msra.mxu1 %v994_v10 }
  0x4c   :  { %922 = vmatprep.subr.bf16.mxu1 %v1050_v43 }
  0x4d   :  { %888 = vmatpush3.bf16.msra.mxu0 %v987_v1 }
  0x4e   :  { %889 = vmatprep.subr.bf16.mxu0 %v988_v2 }
  0x4f   :  { %923 = vmatpush3.bf16.msra.mxu1 %v995_v11 }
  0x50   :  { %924 = vmatprep.subr.bf16.mxu1 %v1050_v43 }
  0x51   :  { %890 = vmatpush3.bf16.msra.mxu0 %v989_v3 }
  0x53   :  { %925 = vmatpush3.bf16.msra.mxu1 %v996_v12 }
  0x54   :  { %575 = vmatmul.mubr.bf16.vlgmr.msra.gmra.mrb[4].mxu0 %v54_v6  ;;  %926 = vmatprep.subr.bf16.mxu1 %v1050_v43 }
  0x57   :  { %927 = vmatpush3.bf16.msra.mxu1 %v997_v13 }
  0x58   :  { %928 = vmatprep.subr.bf16.mxu1 %v1050_v43 }
  0x5b   :  { %929 = vmatpush3.bf16.msra.mxu1 %v998_v14 }
 0x107   :  { %v847_v15 = vpop.f32.mrb[0].mxu0 }
 0x108   :  { %v848_v17 = vpop.f32.mrb[1].mxu0 }
 0x109   :  { %v849_v18 = vadd.f32 %v848_v17, %v847_v15  ;;  %v850_v19 = vpop.f32.mrb[2].mxu0  ;;  %v869_v20 = vpop.f32.mrb[0].mxu1 }
 0x10a   :  { %v851_v21 = vpop.f32.mrb[3].mxu0  ;;  %v870_v24 = vpop.f32.mrb[1].mxu1 }
 0x10b   :  { %v495_v22 = vadd.f32 %v849_v18, %v769_v16  ;;  %v852_v23 = vadd.f32 %v851_v21, %v850_v19  ;;  %v871_v25 = vadd.f32 %v870_v24, %v869_v20  ;;  %v872_v26 = vpop.f32.mrb[2].mxu1 }
 0x10c   :  { %v873_v28 = vpop.f32.mrb[3].mxu1 }
 0x10d   :  { %v498_v27 = vadd.f32 %v852_v23, %v769_v16  ;;  %v536_v29 = vadd.f32 %v871_v25, %v495_v22  ;;  %v874_v30 = vadd.f32 %v873_v28, %v872_v26 }
 0x10f   :  { %v539_v31 = vadd.f32 %v874_v30, %v498_v27 }
 0x111   :  { %v617_v32 = vpop.f32.mrb[4].mxu1 }
 0x112   :  { %v912_v33 = vpop.f32.mrb[5].mxu1 }
 0x113   :  { %v620_v34 = vpop.f32.mrb[6].mxu1 }
 0x114   :  { %v913_v35 = vpop.f32.mrb[7].mxu1 }
 0x127   :  { %v891_v36 = vpop.f32.mrb[4].mxu0 }
 0x128   :  { %v892_v37 = vpop.f32.mrb[5].mxu0 }
 0x129   :  { %v893_v38 = vadd.f32 %v892_v37, %v891_v36  ;;  %v894_v39 = vpop.f32.mrb[6].mxu0 }
 0x12a   :  { %v895_v40 = vpop.f32.mrb[7].mxu0 }
 0x12b   :  { %v577_v41 = vadd.f32 %v893_v38, %v536_v29  ;;  %v896_v42 = vadd.f32 %v895_v40, %v894_v39 }
 0x12d   :  { %v618_v43 = vadd.f32 %v617_v32, %v577_v41  ;;  %v580_v44 = vadd.f32 %v896_v42, %v539_v31 }
 0x12f   :  { %v820_v45 = vclamps-f32 %v618_v43, 2.0  ;;  %v621_v46 = vadd.f32 %v620_v34, %v580_v44 }
 0x131   :  { %v628_v47 = vmul.f32 0.25, %v820_v45  ;;  %v630_v48 = vand.u32 2147483647, %v820_v45  ;;  %v821_v49 = vclamps-f32 %v621_v46, 2.0 }
 0x133   :  { %v632_v50 = vmul.f32 %v630_v48, %v628_v47  ;;  %v629_v51 = vmul.f32 0.25, %v821_v49  ;;  %v631_v52 = vand.u32 2147483647, %v821_v49 }
 0x135   :  { %v633_v53 = vmul.f32 %v631_v52, %v629_v51  ;;  %v634_v54 = vsub.f32 %v820_v45, %v632_v50 }
 0x137   :  { %v635_v55 = vsub.f32 %v821_v49, %v633_v53 }
 0x139   :  { %v636_v56 = vpack.c.bf16 %v635_v55, %v634_v54 }
 0x13b   :  { %931 = vmatmul.mubr.bf16.vlgmr.msra.gmra.mrb[8].mxu1 %v636_v56 }
 0x20e   :  { %v742_v58 = vpop.f32.mrb[8].mxu1 }
 0x20f   :  { %v743_v59 = vadd.f32 %v822_v57, %v742_v58  ;;  %v932_v60 = vpop.f32.mrb[9].mxu1 }
 0x210   :  { %v745_v61 = vpop.f32.mrb[10].mxu1 }
 0x211   :  { %750 = vst.msk [vmem:[#allocation5] sm:$0xff] %vm749_vm2, %v743_v59  ;;  %v746_v62 = vadd.f32 %v822_v57, %v745_v61  ;;  %v933_v63 = vpop.f32.mrb[11].mxu1 }
 0x213   :  { %751 = vst.msk [vmem:[#allocation5 + $0x8] sm:$0xff] %vm749_vm2, %v746_v62 }
 0x214   :  { %756 = vsyncadd [#allocation4], 128  ;;  %s1052_s25 = smov [#allocation5]  }
 0x215   :  { %s757_s26 = sshll.u32 %s1052_s25, 4  ;;  %s758_s26 = int_to_ptr.vmem [resolvable:$true] %s757_s26 }
 0x216   :  { %s1021_s27 = scalar_lea.vmem %s758_s26, 128  ;;  %s1025_s28 = scalar_lea.vmem %s758_s26, 256 }
 0x217   :  { %p1022_p8 = scmp.ne.s32.totalorder %s758_s26, %s1021_s27  ;;  %p1026_p9 = scmp.lt.s32.totalorder %s758_s26, %s758_s26 }
 0x218   :  { %p1027_p10 = scmp.lt.s32.totalorder %s1025_s28, %s1021_s27 }
 0x21a   :  { %p1028_p11 = por %p1027_p10, %p1026_p9 }
 0x21c   :  { %p1029_p12 = pnand %p1028_p11, %p1022_p8 }
 0x21e   :  { %1032 = shalt.err (!%p1029_p12)
}
 0x21f   :  { %s1033_s30 = scalar_lea.hbm %s1199_s5, 128 }
 0x220   :  { %p1034_p13 = scmp.ne.s32.totalorder %s1199_s5, %s1033_s30  ;;  %p1037_p0 = scmp.lt.u32.totalorder %s1033_s30, %s1199_s5 }
 0x222   :  { %p1039_p1 = pnand %p1037_p0, %p1034_p13 }
 0x224   :  { %1042 = shalt.err (!%p1039_p1)
}
 0x225   :  { %s1053_s9 = smov 128   ;;  %s1054_s10 = smov 8  }
 0x226   :  { %763 = dma.vmem_to_hbm [thread:$0]  %s758_s26, 128, %s1199_s5, [#allocation4], %s1053_s9, %s1053_s9, %s1054_s10  }
 0x227   :  { %1045 = dma.done.wait [#allocation4], 256  }
 0x228   :  { %1046 = vsyncadd [#allocation4], 4294967040 }
 0x229   :  { %767 = vsyncpa [#allocation3], 1 }
 0x22a   :  { %768 = vsyncpa [#allocation4], 1 }

</bundles_post_ra>
